<compile_context>
chip_gen: v5e
topology: v5e:2x2
jax: 0.10.0
libtpu: 0.0.40
codegen_flags: <defaults>
</compile_context>

<pallas_src>
import functools

import jax
import jax.numpy as jnp
from jax import lax
from jax.experimental import pallas as pl
from jax.experimental.pallas import tpu as pltpu


def _round_up(x, m):
    return (x + m - 1) // m * m


# --------------------------------------------------------------------------
# Kernel
# --------------------------------------------------------------------------
def _gated_sae_kernel(x_ref, w_enc_ref, w_dec_ref, dec_bias_ref, biases_ref,
                      out_ref, acc_ref):
    h = pl.program_id(1)

    @pl.when(h == 0)
    def _():
        # decoder_bias folded into the accumulator init (saves a bb x D f32
        # add and a second dec_bias read at the finalize step).
        acc_ref[...] = jnp.broadcast_to(
            dec_bias_ref[...].astype(jnp.float32), acc_ref.shape)

    x = x_ref[...]                                   # [Bt, D]   (native dtype)
    w_enc = w_enc_ref[...]                           # [Ht, D]
    # x_enc = x @ encoder.weight[tile].T   (decoder_bias already folded into
    # the gate/mag biases on the host).
    # NOTE: contracting the last dim of both operands; if the bundle dump
    # shows a per-tile XLU transpose on the critical path, store the encoder
    # as [D, H] instead.
    x_enc = lax.dot_general(
        x, w_enc, (((1,), (1,)), ((), ())),
        preferred_element_type=jnp.float32)          # [Bt, Ht] f32

    b = biases_ref[...]                              # [3, Ht] f32 (packed)
    exp_r = b[0:1, :]                                # exp(r_mag)
    gate_b = b[1:2, :]                               # gate_bias - off
    mag_b = b[2:3, :]                                # mag_bias - exp_r * off

    pi_gate = x_enc + gate_b
    pi_mag = exp_r * x_enc + mag_b
    # f_gate * relu(pi_mag) as a single select; the *dec_norm / /dec_norm pair
    # of the reference cancels exactly in the x_hat-only forward.
    f = jnp.where(pi_gate > 0, jnp.maximum(pi_mag, 0.0), 0.0)

    # decode: acc += f @ decoder.weight.T  (weight pre-transposed to [H, D],
    # so this is a contiguous [K, N] RHS tile).
    w_dec = w_dec_ref[...]                           # [Ht, D]
    acc_ref[...] += lax.dot_general(
        f.astype(w_dec.dtype), w_dec, (((1,), (0,)), ((), ())),
        preferred_element_type=jnp.float32)

    @pl.when(h == pl.num_programs(1) - 1)
    def _():
        out_ref[...] = acc_ref[...].astype(out_ref.dtype)


# --------------------------------------------------------------------------
# Tile selection (generation-aware)
# --------------------------------------------------------------------------
def _vmem_capacity_bytes():
    try:
        return int(pltpu.get_tpu_info().vmem_capacity_bytes)
    except Exception:
        return 128 * 1024 * 1024


def _choose_tiles(B, Dp, H, block_b, block_h, in_itemsize, out_itemsize):
    vmem_cap = _vmem_capacity_bytes()
    small_vmem = vmem_cap <= (96 << 20)      # v7x: 64 MiB per TensorCore
    budget = int(vmem_cap * 0.75)            # leave headroom for Mosaic

    if block_b is None:
        block_b = 512 if small_vmem else 1024
    if block_h is None:
        block_h = 256 if small_vmem else 1024

    # batch tile: multiple of 8, capped at the (rounded) batch.
    bb = _round_up(min(block_b, _round_up(B, 8)), 8)
    # v7x has 2 TensorCores: keep at least 2 tiles on the parallel batch axis.
    if small_vmem and B > 256 and _round_up(B, bb) // bb < 2:
        bb = min(bb, _round_up((B + 1) // 2, 256))

    # dict tile: multiple of 128 (256-multiples preferred on v6e/v7x).
    Hp128 = _round_up(H, 128)
    if block_h >= H:
        bh = Hp128
    else:
        bh = min(max(128, _round_up(block_h, 128)), Hp128)

    def footprint(bb_, bh_):
        fp = 0
        fp += 2 * bb_ * Dp * in_itemsize           # x (double-buffered)
        fp += 2 * 2 * bh_ * Dp * in_itemsize       # w_enc + w_dec_t
        fp += 2 * (3 * bh_ + Dp) * 4               # packed biases + dec_bias
        fp += 2 * bb_ * Dp * out_itemsize          # out
        fp += bb_ * Dp * 4                         # f32 accumulator
        fp += 3 * bb_ * bh_ * 4                    # x_enc / pi / f intermediates
        return fp

    while footprint(bb, bh) > budget and bh > 256:
        bh = max(256, _round_up(bh // 2, 128))
    while footprint(bb, bh) > budget and bb > 256:
        bb = max(256, _round_up(bb // 2, 8))

    vmem_limit = int(footprint(bb, bh) * 1.25) + (2 << 20)
    vmem_limit = max(16 << 20, min(vmem_limit, vmem_cap - (8 << 20)))
    return bb, bh, vmem_limit


# --------------------------------------------------------------------------
# Wrapper
# --------------------------------------------------------------------------
@functools.partial(jax.jit,
                   static_argnames=("bb", "bh", "vmem_limit", "compute_dtype"))
def _gated_sae_forward_impl(x, w_enc, w_dec, dec_bias, r_mag, gate_bias,
                            mag_bias, *, bb, bh, vmem_limit, compute_dtype):
    B, D = x.shape
    H = w_enc.shape[0]
    out_dtype = x.dtype
    cdt = x.dtype if compute_dtype is None else compute_dtype

    Dp = _round_up(D, 128)
    Bp = _round_up(B, bb)
    Hp = _round_up(H, bh)

    # ---- host-side prep ----------------------------------------------------
    # Fold decoder_bias into the encode biases: x_enc = x@W^T - off.
    exp_r = jnp.exp(r_mag.astype(jnp.float32))
    off = jnp.dot(w_enc.astype(jnp.float32), dec_bias.astype(jnp.float32))
    biases = jnp.stack(
        [exp_r,
         gate_bias.astype(jnp.float32) - off,
         mag_bias.astype(jnp.float32) - exp_r * off], axis=0)     # [3, H] f32

    # TODO(synk): in production store decoder.weight pre-transposed at param
    # load instead of transposing per call.
    w_dec_t = jnp.transpose(w_dec)                                # [H, D]

    x_c = x.astype(cdt)
    w_enc_c = w_enc.astype(cdt)
    w_dec_c = w_dec_t.astype(cdt)
    dec_b2 = dec_bias.astype(jnp.float32).reshape(1, D)

    if Dp != D:
        x_c = jnp.pad(x_c, ((0, 0), (0, Dp - D)))
        w_enc_c = jnp.pad(w_enc_c, ((0, 0), (0, Dp - D)))
        w_dec_c = jnp.pad(w_dec_c, ((0, 0), (0, Dp - D)))
        dec_b2 = jnp.pad(dec_b2, ((0, 0), (0, Dp - D)))
    if Bp != B:
        x_c = jnp.pad(x_c, ((0, Bp - B), (0, 0)))
    if Hp != H:
        # Zero-padded encoder rows give x_enc = 0 and zero folded gate bias,
        # so the strict (pi_gate > 0) gate forces f = 0 for padded features;
        # padded decoder rows are zero as well.
        w_enc_c = jnp.pad(w_enc_c, ((0, Hp - H), (0, 0)))
        w_dec_c = jnp.pad(w_dec_c, ((0, Hp - H), (0, 0)))
        biases = jnp.pad(biases, ((0, 0), (0, Hp - H)))

    grid = (Bp // bb, Hp // bh)

    out = pl.pallas_call(
        _gated_sae_kernel,
        out_shape=jax.ShapeDtypeStruct((Bp, Dp), out_dtype),
        grid_spec=pltpu.PrefetchScalarGridSpec(
            num_scalar_prefetch=0,
            grid=grid,
            in_specs=[
                pl.BlockSpec((bb, Dp), lambda i, h: (i, 0)),   # x tile
                pl.BlockSpec((bh, Dp), lambda i, h: (h, 0)),   # encoder.weight
                pl.BlockSpec((bh, Dp), lambda i, h: (h, 0)),   # decoder.weight^T
                pl.BlockSpec((1, Dp), lambda i, h: (0, 0)),    # decoder_bias
                pl.BlockSpec((3, bh), lambda i, h: (0, h)),    # packed biases
            ],
            out_specs=pl.BlockSpec((bb, Dp), lambda i, h: (i, 0)),
            scratch_shapes=[pltpu.VMEM((bb, Dp), jnp.float32)],
        ),
        compiler_params=pltpu.CompilerParams(
            dimension_semantics=("parallel", "arbitrary"),
            vmem_limit_bytes=vmem_limit,
        ),
    )(x_c, w_enc_c, w_dec_c, dec_b2, biases)

    if Bp != B or Dp != D:
        out = out[:B, :D]
    return out


def gated_sae_forward(x, w_enc, w_dec, dec_bias, r_mag, gate_bias, mag_bias,
                      *, block_b=None, block_h=None, compute_dtype=None):
    """Forward pass of GatedAutoEncoder (output_features=False).

    compute_dtype=jnp.bfloat16 is the recommended production setting when the
    parameters arrive in f32 (halves weight HBM traffic, native MXU rate);
    gating and accumulation stay in f32 either way.
    """
    B, D = x.shape
    H, D2 = w_enc.shape
    assert D == D2 and w_dec.shape == (D, H)
    Dp = _round_up(D, 128)
    cdt = x.dtype if compute_dtype is None else compute_dtype
    in_itemsize = jnp.dtype(cdt).itemsize
    out_itemsize = jnp.dtype(x.dtype).itemsize
    bb, bh, vmem_limit = _choose_tiles(B, Dp, H, block_b, block_h,
                                       in_itemsize, out_itemsize)
    return _gated_sae_forward_impl(
        x, w_enc, w_dec, dec_bias, r_mag, gate_bias, mag_bias,
        bb=bb, bh=bh, vmem_limit=vmem_limit, compute_dtype=compute_dtype)


# --------------------------------------------------------------------------
# Reference + test
# --------------------------------------------------------------------------
def _reference_forward(x, w_enc, w_dec, dec_bias, r_mag, gate_bias, mag_bias):
    # Pure-JAX mirror of GatedAutoEncoder.forward (output_features=False).
    x_enc = (x - dec_bias) @ w_enc.T
    pi_gate = x_enc + gate_bias
    f_gate = (pi_gate > 0).astype(jnp.float32)
    pi_mag = jnp.exp(r_mag) * x_enc + mag_bias
    f_mag = jnp.maximum(pi_mag, 0.0)
    f = f_gate * f_mag
    dec_norm = jnp.sqrt(jnp.sum(w_dec * w_dec, axis=0, keepdims=True))
    f = f * dec_norm
    f = f / dec_norm
    return f @ w_dec.T + dec_bias


def _make_inputs(key, batch, activation_dim, dict_size):
    kx, kenc, kdec, kb1, kb2, kb3, kb4 = jax.random.split(key, 7)
    x = jax.random.normal(kx, (batch, activation_dim), dtype=jnp.float32)
    w_enc = jax.random.normal(kenc, (dict_size, activation_dim),
                              dtype=jnp.float32) * 0.05
    w_dec = jax.random.normal(kdec, (activation_dim, dict_size),
                              dtype=jnp.float32)
    w_dec = w_dec / jnp.linalg.norm(w_dec, axis=0, keepdims=True)
    dec_bias = jax.random.normal(kb1, (activation_dim,), jnp.float32) * 0.1
    r_mag = jax.random.normal(kb2, (dict_size,), jnp.float32) * 0.1
    gate_bias = jax.random.normal(kb3, (dict_size,), jnp.float32) * 0.1
    mag_bias = jax.random.normal(kb4, (dict_size,), jnp.float32) * 0.1
    return x, w_enc, w_dec, dec_bias, r_mag, gate_bias, mag_bias


if __name__ == "__main__":
    key = jax.random.PRNGKey(0)
    k1, k2 = jax.random.split(key)

    # Case 1: small explicit tiles so both grid axes (batch and dict /
    # accumulator) are iterated: grid = (2, 2). f32 end-to-end, tight check.
    args1 = _make_inputs(k1, batch=16, activation_dim=128, dict_size=256)
    out1 = jax.block_until_ready(gated_sae_forward(*args1, block_b=8,
                                                   block_h=128))
    ref1 = _reference_forward(*args1)
    assert out1.shape == ref1.shape
    assert jnp.allclose(out1, ref1, atol=1e-4, rtol=1e-4), (
        float(jnp.max(jnp.abs(out1 - ref1))))

    # Case 2: ragged shapes exercising the batch- and dict-padding paths.
    args2 = _make_inputs(k2, batch=10, activation_dim=128, dict_size=200)
    out2 = jax.block_until_ready(gated_sae_forward(*args2, block_b=256,
                                                   block_h=128))
    ref2 = _reference_forward(*args2)
    assert out2.shape == ref2.shape
    assert jnp.allclose(out2, ref2, atol=1e-4, rtol=1e-4), (
        float(jnp.max(jnp.abs(out2 - ref2))))

    # Case 3: generation-aware auto tile selection + bf16 compute path
    # (loose check: bf16 gating can legitimately flip near-zero gates).
    out3 = jax.block_until_ready(
        gated_sae_forward(*args1, compute_dtype=jnp.bfloat16))
    assert out3.shape == ref1.shape
    assert bool(jnp.isfinite(out3).all())
    assert float(jnp.mean(jnp.abs(out3 - ref1))) < 0.1

    print("KERNEL_OK")
</pallas_src>

<mosaic_0001>
module attributes {stable_mosaic.version = 11 : i64} {
  func.func @_gated_sae_kernel(%arg0: i32, %arg1: i32, %arg2: memref<8x128xf32, #tpu.memory_space<vmem>>, %arg3: memref<128x128xf32, #tpu.memory_space<vmem>>, %arg4: memref<128x128xf32, #tpu.memory_space<vmem>>, %arg5: memref<1x128xf32, #tpu.memory_space<vmem>>, %arg6: memref<3x128xf32, #tpu.memory_space<vmem>>, %arg7: memref<8x128xf32, #tpu.memory_space<vmem>>, %arg8: memref<8x128xf32, #tpu.memory_space<vmem>>) attributes {dimension_semantics = [#tpu.dimension_semantics<parallel>, #tpu.dimension_semantics<arbitrary>], iteration_bounds = array<i64: 2, 2>, scalar_prefetch = 0 : i64, scratch_operands = 1 : i64, tpu.core_type = #tpu.core_type<tc>, window_params = [{transform_indices = @transform_0, window_bounds = array<i64: 8, 128>}, {transform_indices = @transform_1, window_bounds = array<i64: 128, 128>}, {transform_indices = @transform_2, window_bounds = array<i64: 128, 128>}, {pipeline_mode = #tpu.pipeline_mode<synchronous>, transform_indices = @transform_3, window_bounds = array<i64: 1, 128>}, {transform_indices = @transform_4, window_bounds = array<i64: 3, 128>}, {transform_indices = @transform_5, window_bounds = array<i64: 8, 128>}]} {
    %c0_i32 = arith.constant 0 : i32
    %0 = arith.cmpi eq, %arg1, %c0_i32 : i32
    %1 = arith.extui %0 : i1 to i32
    %c0_i32_0 = arith.constant 0 : i32
    %2 = arith.cmpi ne, %1, %c0_i32_0 : i32
    scf.if %2 {
      %c0_17 = arith.constant 0 : index
      %c0_18 = arith.constant 0 : index
      %30 = vector.load %arg5[%c0_17, %c0_18] : memref<1x128xf32, #tpu.memory_space<vmem>>, vector<1x128xf32>
      %31 = vector.shape_cast %30 : vector<1x128xf32> to vector<1x128xf32>
      %32 = vector.broadcast %31 : vector<1x128xf32> to vector<8x128xf32>
      %c0_19 = arith.constant 0 : index
      %c0_20 = arith.constant 0 : index
      %33 = vector.load %arg8[%c0_19, %c0_20] : memref<8x128xf32, #tpu.memory_space<vmem>>, vector<8x128xf32>
      tpu.vector_store %arg8[%c0_19, %c0_20], %32 {strides = array<i32>} : memref<8x128xf32, #tpu.memory_space<vmem>>, vector<8x128xf32>,
    } else {
    }
    %c0 = arith.constant 0 : index
    %c0_1 = arith.constant 0 : index
    %3 = vector.load %arg2[%c0, %c0_1] : memref<8x128xf32, #tpu.memory_space<vmem>>, vector<8x128xf32>
    %c0_2 = arith.constant 0 : index
    %c0_3 = arith.constant 0 : index
    %4 = vector.load %arg3[%c0_2, %c0_3] : memref<128x128xf32, #tpu.memory_space<vmem>>, vector<128x128xf32>
    %cst = arith.constant dense<0.000000e+00> : vector<8x128xf32>
    %5 = tpu.matmul %3, %4, %cst {dimension_numbers = #tpu.dot_dimension_numbers<[1], [1], [0], [0], [0, 0, 1, 0], [], []>} : vector<8x128xf32>, vector<128x128xf32>, vector<8x128xf32> -> vector<8x128xf32>
    %c0_4 = arith.constant 0 : index
    %c0_5 = arith.constant 0 : index
    %6 = vector.load %arg6[%c0_4, %c0_5] : memref<3x128xf32, #tpu.memory_space<vmem>>, vector<3x128xf32>
    %7 = vector.extract_strided_slice %6 {offsets = [0, 0], sizes = [1, 128], strides = [1, 1]} : vector<3x128xf32> to vector<1x128xf32>
    %8 = vector.extract_strided_slice %6 {offsets = [1, 0], sizes = [1, 128], strides = [1, 1]} : vector<3x128xf32> to vector<1x128xf32>
    %9 = vector.extract_strided_slice %6 {offsets = [2, 0], sizes = [1, 128], strides = [1, 1]} : vector<3x128xf32> to vector<1x128xf32>
    %10 = vector.broadcast %8 : vector<1x128xf32> to vector<8x128xf32>
    %11 = arith.addf %5, %10 : vector<8x128xf32>
    %12 = vector.broadcast %7 : vector<1x128xf32> to vector<8x128xf32>
    %13 = arith.mulf %12, %5 : vector<8x128xf32>
    %14 = vector.broadcast %9 : vector<1x128xf32> to vector<8x128xf32>
    %15 = arith.addf %13, %14 : vector<8x128xf32>
    %cst_6 = arith.constant 0.000000e+00 : f32
    %16 = vector.broadcast %cst_6 : f32 to vector<8x128xf32>
    %17 = arith.cmpf ogt, %11, %16 : vector<8x128xf32>
    %cst_7 = arith.constant 0.000000e+00 : f32
    %18 = vector.broadcast %cst_7 : f32 to vector<8x128xf32>
    %19 = arith.maximumf %15, %18 : vector<8x128xf32>
    %cst_8 = arith.constant 0.000000e+00 : f32
    %20 = vector.broadcast %cst_8 : f32 to vector<8x128xf32>
    %21 = arith.select %17, %19, %20 : vector<8x128xi1>, vector<8x128xf32>
    %c0_9 = arith.constant 0 : index
    %c0_10 = arith.constant 0 : index
    %22 = vector.load %arg4[%c0_9, %c0_10] : memref<128x128xf32, #tpu.memory_space<vmem>>, vector<128x128xf32>
    %c0_11 = arith.constant 0 : index
    %c0_12 = arith.constant 0 : index
    %23 = vector.load %arg8[%c0_11, %c0_12] : memref<8x128xf32, #tpu.memory_space<vmem>>, vector<8x128xf32>
    %cst_13 = arith.constant dense<0.000000e+00> : vector<8x128xf32>
    %24 = tpu.matmul %21, %22, %cst_13 {dimension_numbers = #tpu.dot_dimension_numbers<[1], [0], [0], [1], [0, 0, 1, 1], [], []>} : vector<8x128xf32>, vector<128x128xf32>, vector<8x128xf32> -> vector<8x128xf32>
    %25 = arith.addf %23, %24 : vector<8x128xf32>
    %c0_14 = arith.constant 0 : index
    %c0_15 = arith.constant 0 : index
    %26 = vector.load %arg8[%c0_14, %c0_15] : memref<8x128xf32, #tpu.memory_space<vmem>>, vector<8x128xf32>
    tpu.vector_store %arg8[%c0_14, %c0_15], %25 {strides = array<i32>} : memref<8x128xf32, #tpu.memory_space<vmem>>, vector<8x128xf32>,
    %c1_i32 = arith.constant 1 : i32
    %27 = arith.cmpi eq, %arg1, %c1_i32 : i32
    %28 = arith.extui %27 : i1 to i32
    %c0_i32_16 = arith.constant 0 : i32
    %29 = arith.cmpi ne, %28, %c0_i32_16 : i32
    scf.if %29 {
      %c0_17 = arith.constant 0 : index
      %c0_18 = arith.constant 0 : index
      %30 = vector.load %arg8[%c0_17, %c0_18] : memref<8x128xf32, #tpu.memory_space<vmem>>, vector<8x128xf32>
      %c0_19 = arith.constant 0 : index
      %c0_20 = arith.constant 0 : index
      %31 = vector.load %arg7[%c0_19, %c0_20] : memref<8x128xf32, #tpu.memory_space<vmem>>, vector<8x128xf32>
      tpu.vector_store %arg7[%c0_19, %c0_20], %30 {strides = array<i32>} : memref<8x128xf32, #tpu.memory_space<vmem>>, vector<8x128xf32>,
    } else {
    }
    return
  }
  func.func @transform_0(%arg0: i32, %arg1: i32) -> (i32, i32) {
    %c0_i32 = arith.constant 0 : i32
    %c0_i32_0 = arith.constant 0 : i32
    return %arg0, %c0_i32 : i32, i32
  }
  func.func @transform_1(%arg0: i32, %arg1: i32) -> (i32, i32) {
    %c0_i32 = arith.constant 0 : i32
    %c0_i32_0 = arith.constant 0 : i32
    return %arg1, %c0_i32 : i32, i32
  }
  func.func @transform_2(%arg0: i32, %arg1: i32) -> (i32, i32) {
    %c0_i32 = arith.constant 0 : i32
    %c0_i32_0 = arith.constant 0 : i32
    return %arg1, %c0_i32 : i32, i32
  }
  func.func @transform_3(%arg0: i32, %arg1: i32) -> (i32, i32) {
    %c0_i32 = arith.constant 0 : i32
    %c0_i32_0 = arith.constant 0 : i32
    %c0_i32_1 = arith.constant 0 : i32
    return %c0_i32, %c0_i32_0 : i32, i32
  }
  func.func @transform_4(%arg0: i32, %arg1: i32) -> (i32, i32) {
    %c0_i32 = arith.constant 0 : i32
    %c0_i32_0 = arith.constant 0 : i32
    return %c0_i32, %arg1 : i32, i32
  }
  func.func @transform_5(%arg0: i32, %arg1: i32) -> (i32, i32) {
    %c0_i32 = arith.constant 0 : i32
    %c0_i32_0 = arith.constant 0 : i32
    return %arg0, %c0_i32 : i32, i32
  }
}

</mosaic_0001>

<bundles_post_ra>
// kernel: _gated_sae_forward_impl.1
= control target key start
LH: loop header
LB: loop body
LE: loop exit
PB: predicated region body
PF: predicated region fallthrough
CT: control target
= control target key end

     0   :  { %10 = vsyncpa [#allocation4], 0  ;;  %s920_s0 = inlined_call_operand.vmem [shape: f32[16,128], index: 0, kind: input, shape index: {}]   ;;  %s921_s1 = inlined_call_operand.vmem [shape: f32[256,128], index: 1, kind: input, shape index: {}]   ;;  %s922_s2 = inlined_call_operand.vmem [shape: f32[256,128], index: 2, kind: input, shape index: {}]   ;;  %s923_s3 = inlined_call_operand.vmem [shape: f32[1,128], index: 3, kind: input, shape index: {}]   ;;  %s924_s4 = inlined_call_operand.vmem [shape: f32[3,256], index: 4, kind: input, shape index: {}]   ;;  %s925_s5 = inlined_call_operand.hbm [shape: f32[16,128], index: 5, kind: output, shape index: {}]  }
   0x1   :  { %12 = vsyncpa [#allocation4 + $0x1], 0  ;;  %s733_s18 = smov 0   ;;  %s735_s19 = smov 0  }
   0x2   :  { %s737_s20 = smov 0   ;;  %s739_s21 = smov 0  }
   0x3   :  { %s741_s22 = smov 0   ;;  %s743_s23 = smov 0  }
   0x4   :  { %s745_s24 = smov 0   ;;  %s747_s25 = smov 0  }
   0x5 LB: > { %931 = sst [smem:[#allocation6_spill]] %s681_s20  ;;  %s516_s26 = sadd.s32 4294967295, %s701_s25   ;;  %s701_s25 = sphi %s747_s25, %s18_s25   ;;  %s697_s24 = sphi %s745_s24, %s945_s24   ;;  %s693_s23 = sphi %s743_s23, %s944_s23   ;;  %s689_s22 = sphi %s741_s22, %s943_s22   ;;  %s685_s21 = sphi %s739_s21, %s942_s21   ;;  %s681_s20 = sphi %s737_s20, %s941_s20   ;;  %s677_s19 = sphi %s735_s19, %s947_s19   ;;  %s673_s18 = sphi %s733_s18, %s946_s18  }
   0x6   : > { %932 = sst [smem:[#allocation7_spill]] %s693_s23  ;;  %s517_s27 = sadd.s32 4294967294, %s701_s25  }
   0x7   : > { %933 = sst [smem:[#allocation8_spill]] %s697_s24  ;;  %s27_s28 = sadd.s32 1, %s693_s23 }
   0x8   : > { %p28_p0 = scmp.ge.s32.totalorder %s27_s28, 2  ;;  %s30_s29 = sadd.s32 1, %s697_s24 }
   0x9   : > { %p172_p1 = scmp.ne.s32.totalorder %s681_s20, %s677_s19  ;;  %p173_p2 = scmp.eq.s32.totalorder %s516_s26, 3 }
   0xa   : > { %s949_s28 = smov (%p28_p0, %s27_s28), 0  ;;  %s951_s29 = smov (!%p28_p0, %s30_s29), %s697_s24 }
   0xb   : > { %934 = sst [smem:[#allocation9_spill]] %s949_s28  ;;  %p782_p3 = por %p173_p2, %p172_p1 }
   0xc   : > { %p178_p4 = scmp.ne.s32.totalorder %s677_s19, %s673_s18  ;;  %p32_p5 = scmp.ge.s32.totalorder %s951_s29, 2 }
   0xd   : > { %p179_p6 = scmp.eq.s32.totalorder %s517_s27, 3  ;;  %p520_p7 = scmp.ge.s32.totalorder %s701_s25, 1 }
   0xe   : > { %p232_p8 = scmp.lt.s32.totalorder %s701_s25, 5  ;;  %s953_s29 = smov (%p32_p5, %s951_s29), 0 }
   0xf   : > { %936 = sst [smem:[#allocation10_spill]] %s953_s29  ;;  %p792_p9 = por %p179_p6, %p178_p4 }
  0x10   : > { %p233_p10 = pnand %p520_p7, %p232_p8  ;;  %s159_s7 = ssub.s32 %s697_s24, %s953_s29 }
  0x11   : > { %s162_s8 = sadd.s32 1, %s681_s20  ;;  %p160_p11 = scmp.eq.s32.totalorder %s159_s7, 0 }
  0x12   : > { %236 = sbr.rel (%p233_p10) target bundleno = 384 (0x180), region = 40  ;;  %s926_s10 = sand.u32 (!%p233_p10), 1, %s677_s19  }
  0x13   : > { %s800_s9 = scalar_select %p160_p11, %s681_s20, %s162_s8  }
  0x14   : > { %p273_p12 = scmp.lt.s32.totalorder (!%p233_p10), %s689_s22, 1  ;;  %s806_s11 = sshll.u32 (!%p233_p10), %s926_s10, 3 }
  0x15   : > { %938 = sst [smem:[#allocation11_spill]] %s800_s9  ;;  %s523_s12 = sshll.u32 (!%p233_p10), %s685_s21, 4 }
  0x16   : > { %p278_p13 = scmp.lt.s32.totalorder (!%p233_p10), %s523_s12, 31  ;;  %p289_p0 = scmp.lt.s32.totalorder (!%p233_p10), %s685_s21, 1 }
  0x17   : > { %s274_s13 = scalar_select %p273_p12, %s689_s22, 1 }
  0x18   : > { %s955_s12 = smov (!%p278_p13, %s523_s12), 31  ;;  %p528_p1 = scmp.ne.s32.totalorder %s685_s21, 0 }
  0x19   : > { %s522_s14 = sshll.u32 %s274_s13, 3  ;;  %s524_s26 = sshll.u32 %s955_s12, 3 }
  0x1a   : > { %s814_s17 = scalar_lea.vmem %s920_s0, %s522_s14  ;;  %s819_s8 = scalar_lea.vmem %s921_s1, %s524_s26 }
  0x1b   : > { %s824_s28 = scalar_lea.vmem %s922_s2, %s524_s26  ;;  %s272_s14 = scalar_lea.vmem [#allocation3], %s806_s11 }
  0x1c   : > { %s290_s24 = scalar_select %p289_p0, %s685_s21, 1 }
  0x1d   : > { %296 = sbr.rel (%p528_p1) target bundleno = 36 (0x24), region = 44 }
  0x1e   : > { %s527_s23 = sshll.u32 %s290_s24, 2 }
  0x1f   : > { %s830_s20 = scalar_lea.vmem %s924_s4, %s527_s23 }
  0x22   : > { %v606_v0 = vld [vmem:[%s923_s3] ss:$0 sm:$0xff] }
  0x23   : > { %301 = vst [vmem:[#allocation2] sm:$0xff] %v606_v0 }
  0x24 PF: > { %v318_v1 = vld [vmem:[%s819_s8 + $0x78] sm:$0xff]  ;;  %v317_v2 = vld [vmem:[%s819_s8 + $0x70] sm:$0xff]  ;;  %v316_v3 = vld [vmem:[%s819_s8 + $0x68] sm:$0xff]  ;;  %p530_p2 = scmp.ne.s32.totalorder %s685_s21, 1 }
  0x25   : > { %319 = vmatpush.xpose.msra.mxu0 %v318_v1  ;;  %v315_v4 = vld [vmem:[%s819_s8 + $0x60] sm:$0xff]  ;;  %v314_v5 = vld [vmem:[%s819_s8 + $0x58] sm:$0xff]  ;;  %v313_v6 = vld [vmem:[%s819_s8 + $0x50] sm:$0xff] }
  0x26   : > { %v312_v7 = vld [vmem:[%s819_s8 + $0x48] sm:$0xff]  ;;  %v311_v8 = vld [vmem:[%s819_s8 + $0x40] sm:$0xff]  ;;  %v310_v9 = vld [vmem:[%s819_s8 + $0x38] sm:$0xff] }
  0x27   : > { %v364_v10 = vld [vmem:[%s824_s28 + $0x78] sm:$0xff]  ;;  %v363_v11 = vld [vmem:[%s824_s28 + $0x70] sm:$0xff]  ;;  %v362_v13 = vld [vmem:[%s824_s28 + $0x68] sm:$0xff] }
  0x28   : > { %366 = vmatpush.msra.mxu1 %v364_v10  ;;  %v309_v12 = vld [vmem:[%s819_s8 + $0x30] sm:$0xff]  ;;  %v361_v14 = vld [vmem:[%s824_s28 + $0x60] sm:$0xff]  ;;  %v308_v15 = vld [vmem:[%s819_s8 + $0x28] sm:$0xff] }
  0x29   : > { %320 = vmatpush.xpose.msra.mxu0 %v317_v2  ;;  %v360_v16 = vld [vmem:[%s824_s28 + $0x58] sm:$0xff]  ;;  %v359_v17 = vld [vmem:[%s824_s28 + $0x50] sm:$0xff]  ;;  %v307_v18 = vld [vmem:[%s819_s8 + $0x20] sm:$0xff] }
  0x2a   : > { %367 = vmatpush.msra.mxu1 %v363_v11  ;;  %v358_v19 = vld [vmem:[%s824_s28 + $0x48] sm:$0xff]  ;;  %v357_v20 = vld [vmem:[%s824_s28 + $0x40] sm:$0xff]  ;;  %v306_v21 = vld [vmem:[%s819_s8 + $0x18] sm:$0xff] }
  0x2b   : > { %v356_v22 = vld [vmem:[%s824_s28 + $0x38] sm:$0xff]  ;;  %v355_v23 = vld [vmem:[%s824_s28 + $0x30] sm:$0xff]  ;;  %v354_v25 = vld [vmem:[%s824_s28 + $0x28] sm:$0xff] }
  0x2c   : > { %368 = vmatpush.msra.mxu1 %v362_v13  ;;  %v305_v24 = vld [vmem:[%s819_s8 + $0x10] sm:$0xff]  ;;  %v353_v26 = vld [vmem:[%s824_s28 + $0x20] sm:$0xff]  ;;  %v304_v27 = vld [vmem:[%s819_s8 + $0x8] sm:$0xff] }
  0x2d   : > { %321 = vmatpush.xpose.msra.mxu0 %v316_v3  ;;  %v303_v28 = vld [vmem:[%s819_s8] sm:$0xff]  ;;  %v352_v30 = vld [vmem:[%s824_s28 + $0x18] sm:$0xff]  ;;  %v351_v31 = vld [vmem:[%s824_s28 + $0x10] sm:$0xff] }
  0x2e   : > { %369 = vmatpush.msra.mxu1 %v361_v14  ;;  %v302_v29 = vld [vmem:[%s814_s17] sm:$0xff]  ;;  %v350_v32 = vld [vmem:[%s824_s28 + $0x8] sm:$0xff] }
  0x2f   : > { %v349_v33 = vld [vmem:[%s824_s28] sm:$0xff] }
  0x30   : > { %370 = vmatpush.msra.mxu1 %v360_v16  ;;  %v339_v34 = vld [vmem:[%s830_s20] sm:$0x7] }
  0x31   : > { %322 = vmatpush.xpose.msra.mxu0 %v315_v4  ;;  %v342_v35 = vperm.slane %v339_v34, 0  ;;  %v340_v36 = vperm.slane %v339_v34, 1  ;;  %v344_v37 = vperm.slane %v339_v34, 2  ;;  %v365_v43 = vld [vmem:[#allocation2] sm:$0xff] }
  0x32   : > { %371 = vmatpush.msra.mxu1 %v359_v17 }
  0x34   : > { %372 = vmatpush.msra.mxu1 %v358_v19 }
  0x35   : > { %323 = vmatpush.xpose.msra.mxu0 %v314_v5 }
  0x36   : > { %373 = vmatpush.msra.mxu1 %v357_v20 }
  0x38   : > { %374 = vmatpush.msra.mxu1 %v356_v22 }
  0x39   : > { %324 = vmatpush.xpose.msra.mxu0 %v313_v6 }
  0x3a   : > { %375 = vmatpush.msra.mxu1 %v355_v23 }
  0x3c   : > { %376 = vmatpush.msra.mxu1 %v354_v25 }
  0x3d   : > { %325 = vmatpush.xpose.msra.mxu0 %v312_v7 }
  0x3e   : > { %377 = vmatpush.msra.mxu1 %v353_v26 }
  0x40   : > { %378 = vmatpush.msra.mxu1 %v352_v30 }
  0x41   : > { %326 = vmatpush.xpose.msra.mxu0 %v311_v8 }
  0x42   : > { %379 = vmatpush.msra.mxu1 %v351_v31 }
  0x44   : > { %380 = vmatpush.msra.mxu1 %v350_v32 }
  0x45   : > { %327 = vmatpush.xpose.msra.mxu0 %v310_v9 }
  0x46   : > { %381 = vmatpush.msra.mxu1 %v349_v33 }
  0x49   : > { %328 = vmatpush.xpose.msra.mxu0 %v309_v12 }
  0x4d   : > { %329 = vmatpush.xpose.msra.mxu0 %v308_v15 }
  0x51   : > { %330 = vmatpush.xpose.msra.mxu0 %v307_v18 }
  0x55   : > { %331 = vmatpush.xpose.msra.mxu0 %v306_v21 }
  0x59   : > { %332 = vmatpush.xpose.msra.mxu0 %v305_v24 }
  0x5d   : > { %333 = vmatpush.xpose.msra.mxu0 %v304_v27 }
  0x61   : > { %334 = vmatpush.xpose.msra.mxu0 %v303_v28 }
  0x64   : > { %335 = vmatmul.f32.vlgmr.msra.gmra.mxu0 %v302_v29 }
  0xe1   : > { %v336_v38 = vpop.f32.mrf.mxu0 }
  0xe2   : > { %v343_v39 = vmul.f32 %v342_v35, %v336_v38  ;;  %v341_v40 = vadd.f32 %v340_v36, %v336_v38 }
  0xe4   : > { %v345_v41 = vadd.f32 %v344_v37, %v343_v39  ;;  %vm346_vm0 = vcmp.gt.f32.partialorder %v341_v40, 0.0 }
  0xe6   : > { %v347_v42 = vmax.f32 %v345_v41, 0.0 }
  0xe8   : > { %529 = vmatmul.msk.f32.vlgmr.msra.gmra.mxu1 %vm346_vm0, %v347_v42 }
 0x164   : > { %391 = sbr.rel (%p530_p2) target bundleno = 369 (0x171), region = 48 }
 0x165   : > { %v383_v44 = vpop.f32.mrf.mxu1 }
 0x166   : > { %v386_v45 = vadd.f32 %v383_v44, %v365_v43 }
 0x168   : > { %387 = vst [vmem:[#allocation2] sm:$0xff] %v386_v45 }
 0x16f   : > { %v392_v46 = vld [vmem:[#allocation2] sm:$0xff] }
 0x170   : > { %393 = vst [vmem:[%s272_s14] sm:$0xff] %v392_v46 }
 0x171 PF: > { %s532_s20 = sshll.u32 %s689_s22, 3  ;;  %s407_s29 = sshll.u32 %s272_s14, 4  ;;  %s408_s29 = int_to_ptr.vmem [resolvable:$true] %s407_s29 }
 0x172   : > { %s405_s28 = scalar_lea.hbm %s925_s5, %s532_s20  ;;  %s939_s21 = sand.u32 1, %s677_s19  }
 0x173   : > { %s409_s9 = sshll.u32 %s405_s28, 4  ;;  %s395_s10 = scalar_lea.sflag [#allocation4], %s939_s21  ;;  %s410_s9 = int_to_ptr.hbm [resolvable:$true] %s409_s9 }
 0x174   : > { %s621_s16 = sshra.s32 %s410_s9, 4  ;;  %s627_s27 = scalar_lea.hbm %s925_s5, 16  ;;  %s622_s16 = int_to_ptr.hbm [resolvable:$true] %s621_s16 }
 0x175   : > { %s623_s17 = scalar_lea.hbm %s622_s16, 8  ;;  %p628_p7 = scmp.lt.s32.totalorder %s622_s16, %s925_s5 }
 0x176   : > { %p624_p4 = scmp.ne.s32.totalorder %s622_s16, %s623_s17  ;;  %p629_p8 = scmp.lt.s32.totalorder %s627_s27, %s623_s17 }
 0x178   : > { %p625_p5 = pnand %p624_p4, %p782_p3  ;;  %p630_p10 = por %p629_p8, %p628_p7 }
 0x17a   : > { %p626_p6 = pneg %p625_p5 }
 0x17c   : > { %p631_p11 = pnand %p630_p10, %p626_p6 }
 0x17e   : > { %634 = shalt.err (!%p631_p11)
}
 0x17f   : > { %535 = dma.vmem_to_hbm [thread:$0]  (%p782_p3), %s408_s29, 128, %s410_s9, %s395_s10  }
 0x180 PF: > { %p541_p12 = scmp.ge.s32.totalorder %s701_s25, 2  ;;  %s421_s11 = sand.u32 1, %s673_s18  }
 0x181   : > { %s422_s13 = scalar_lea.sflag [#allocation4], %s421_s11 }
 0x182   : > { %p538_p13 = pnand %p541_p12, %p792_p9 }
 0x184   : > { %p539_p0 = pneg %p538_p13 }
 0x186   : > { %668 = dma.done.wait (%p539_p0), %s422_s13, 128  }
 0x187   : > { %670 = vsyncadd (%p539_p0), %s422_s13, 4294967168  ;;  %s18_s25 = sadd.s32 1, %s701_s25   ;;  %s940_s14 = sld [smem:[#allocation6_spill]] }
 0x188   : > { %p15_p1 = scmp.ge.s32.totalorder %s18_s25, 6   ;;  %s941_s20 = sld [smem:[#allocation11_spill]] }
 0x189   : > { %s942_s21 = sld [smem:[#allocation7_spill]]  ;;  %s946_s18 = smov %s677_s19 }
 0x18a   : > { %s943_s22 = sld [smem:[#allocation8_spill]]  ;;  %17 = sbr.rel (!%p15_p1) target bundleno = 5 (0x5), region = 92 }
 0x18b   : > { %s944_s23 = sld [smem:[#allocation9_spill]] }
 0x18c   : > { %s945_s24 = sld [smem:[#allocation10_spill]] }
 0x18d   : > { %s947_s19 = smov %s940_s14 }
 0x18f   :  { %428 = vsyncpa [#allocation4], 1 }
 0x190   :  { %430 = vsyncpa [#allocation4 + $0x1], 1 }

</bundles_post_ra>
